<compile_context>
chip_gen: v6e
topology: v6e:2x2x1
jax: 0.10.0
libtpu: 0.0.40
codegen_flags: <defaults>
</compile_context>

<pallas_src>
import functools

import jax
import jax.numpy as jnp
from jax import lax
from jax.experimental import pallas as pl
from jax.experimental.pallas import tpu as pltpu


def _round_up(v, m):
    return ((v + m - 1) // m) * m


def featpro_kernel(x_ref, w_ref, b_ref, eps_ref, z_ref, acc_ref, *,
                   hw, bhw, n_chunks, n_pad):
    # x_ref:   (bB, C, bHW)   input tile (f32 or bf16)
    # w_ref:   (C, 2*n_pad)   fused [W_mu | W_var] weight (f32)
    # b_ref:   (1, 2*n_pad)   fused bias (f32)
    # eps_ref: (bB, n_pad)    reparameterization noise (f32)
    # z_ref:   (bB, n_pad)    output
    # acc_ref: (bB, C, 128)   f32 partial-sum accumulator (VPU-only per step)
    hw_step = pl.program_id(1)

    @pl.when(hw_step == 0)
    def _():
        acc_ref[...] = jnp.zeros_like(acc_ref)

    # Accumulate this HW tile 128-lane chunk at a time: plain VPU adds, no per-step
    # XLU reduce / relayout.  Lanes past the true HW extent (possible only in the
    # last HW block) are masked to zero.
    base = hw_step * bhw
    lane = lax.broadcasted_iota(jnp.int32, (1, 1, 128), 2)
    for i in range(n_chunks):
        chunk = x_ref[:, :, i * 128:(i + 1) * 128].astype(jnp.float32)
        valid = (base + i * 128 + lane) < hw
        acc_ref[...] += jnp.where(valid, chunk, 0.0)

    @pl.when(hw_step == pl.num_programs(1) - 1)
    def _():
        # Single lane-reduce + relayout to (bB, C), then the fused head epilogue.
        pooled = jnp.sum(acc_ref[...], axis=-1) * (1.0 / hw)             # (bB, C)
        out = jnp.dot(pooled, w_ref[...],
                      preferred_element_type=jnp.float32) + b_ref[...]   # (bB, 2*n_pad)
        mu = out[:, :n_pad]
        log_var = out[:, n_pad:]
        std = jnp.exp(log_var * 0.5)
        z_ref[...] = (eps_ref[...] * std + mu).astype(z_ref.dtype)


def featpro_forward(x_nchw, w_mu, b_mu, w_var, b_var, eps):
    """x_nchw: (B, C, H, W); w_*: (num_classes, C) torch-style; b_*: (num_classes,);
    eps: (B, num_classes) standard-normal noise. Returns z: (B, num_classes) float32."""
    B, C, H, W = x_nchw.shape
    N = w_mu.shape[0]
    HW = H * W
    itemsize = jnp.dtype(x_nchw.dtype).itemsize

    # (B, C, H, W) -> (B, C, HW).
    # TODO(synk): in the real net, have the upstream producer emit (B, C, H*W) directly;
    # this reshape can cost one XLA relayout pass over x (verify in HLO).
    x_bch = x_nchw.reshape(B, C, HW)

    # Pad num_classes up to a multiple of 128 (lane-dense outputs, aligned head split).
    n_pad = _round_up(N, 128)
    hw_pad = _round_up(HW, 128)

    def pad_n(a, axis):
        pw = [(0, 0)] * a.ndim
        pw[axis] = (0, n_pad - N)
        return jnp.pad(a, pw)

    # Fuse the two heads: one (C, 2*n_pad) weight and one (1, 2*n_pad) bias.  Padded
    # columns are zero, so padded z columns are just eps and get sliced off below.
    w_cat = jnp.concatenate(
        [pad_n(w_mu.T.astype(jnp.float32), 1), pad_n(w_var.T.astype(jnp.float32), 1)],
        axis=1)
    b_cat = jnp.concatenate(
        [pad_n(b_mu.reshape(1, N).astype(jnp.float32), 1),
         pad_n(b_var.reshape(1, N).astype(jnp.float32), 1)],
        axis=1)
    eps_p = pad_n(eps.astype(jnp.float32), 1)

    # ---- Generation-aware VMEM budget -------------------------------------------------
    try:
        vmem_cap = int(pltpu.get_tpu_info().vmem_capacity_bytes)
    except Exception:
        vmem_cap = 64 * 1024 * 1024            # conservative (v7x physical VMEM)
    vmem_limit = int(min((3 * vmem_cap) // 4, 96 * 1024 * 1024))

    w_bytes = C * 2 * n_pad * 4
    b_bytes = 2 * n_pad * 4

    def x_block_budget(bb):
        # Everything else resident in VMEM: (double-buffered) weights/bias, eps blocks,
        # the resident z block, the f32 accumulator scratch, plus headroom.
        reserve = (2 * (w_bytes + b_bytes) + 4 * bb * n_pad * 4
                   + bb * C * 128 * 4 + (2 << 20))
        return (vmem_limit - reserve) // 2     # per x buffer (x is double-buffered)

    # ---- Batch block: multiple of 8, divides B, keeps >= 2 "parallel" blocks (v7x) ----
    cands = [c for c in (128, 64, 32, 16, 8) if B % c == 0 and B // c >= 2]
    bB = None
    for want_hw in (min(hw_pad, 512), 128):
        for c in cands:
            if x_block_budget(c) >= c * C * want_hw * itemsize:
                bB = c
                break
        if bB is not None:
            break
    if bB is None:
        bB = cands[-1] if cands else B

    # ---- HW tile: multiple of 128, sized from the VMEM budget, capped at 32 chunks ----
    budget = max(x_block_budget(bB), bB * C * 128 * itemsize)
    bhw = (budget // (bB * C * itemsize)) // 128 * 128
    bhw = int(max(128, min(bhw, hw_pad, 32 * 128)))
    n_chunks = bhw // 128

    # If a pathological config (huge fused weight) overflows the planned limit but still
    # physically fits, raise the scoped limit up to the physical capacity.
    x_block_bytes = bB * C * bhw * itemsize
    projected = (2 * x_block_bytes + 2 * (w_bytes + b_bytes)
                 + 4 * bB * n_pad * 4 + bB * C * 128 * 4 + (2 << 20))
    vmem_limit = int(min(vmem_cap, max(vmem_limit, projected)))

    grid = (B // bB, pl.cdiv(HW, bhw))

    kern = functools.partial(featpro_kernel, hw=HW, bhw=bhw,
                             n_chunks=n_chunks, n_pad=n_pad)

    z_pad = pl.pallas_call(
        kern,
        out_shape=jax.ShapeDtypeStruct((B, n_pad), jnp.float32),
        grid=grid,
        in_specs=[
            pl.BlockSpec((bB, C, bhw), lambda b, h: (b, 0, h)),
            pl.BlockSpec((C, 2 * n_pad), lambda b, h: (0, 0)),
            pl.BlockSpec((1, 2 * n_pad), lambda b, h: (0, 0)),
            pl.BlockSpec((bB, n_pad), lambda b, h: (b, 0)),
        ],
        out_specs=pl.BlockSpec((bB, n_pad), lambda b, h: (b, 0)),
        scratch_shapes=[pltpu.VMEM((bB, C, 128), jnp.float32)],
        compiler_params=pltpu.CompilerParams(
            dimension_semantics=("parallel", "arbitrary"),
            vmem_limit_bytes=vmem_limit),
    )(x_bch, w_cat, b_cat, eps_p)

    return z_pad[:, :N]


if __name__ == "__main__":
    # Small shapes consistent with featPro: in_channels=4, spatial 16x16, num_classes=10.
    B, C, H, W = 2, 4, 16, 16
    NUM_CLASSES = 10

    key = jax.random.PRNGKey(0)
    k_x, k_wmu, k_bmu, k_wvar, k_bvar, k_eps = jax.random.split(key, 6)

    x = jax.random.normal(k_x, (B, C, H, W), dtype=jnp.float32)

    # Deterministic parameter init mimicking nn.Linear: U(-1/sqrt(C), 1/sqrt(C)).
    bound = 1.0 / (C ** 0.5)
    w_mu = jax.random.uniform(k_wmu, (NUM_CLASSES, C), minval=-bound, maxval=bound)
    b_mu = jax.random.uniform(k_bmu, (NUM_CLASSES,), minval=-bound, maxval=bound)
    w_var = jax.random.uniform(k_wvar, (NUM_CLASSES, C), minval=-bound, maxval=bound)
    b_var = jax.random.uniform(k_bvar, (NUM_CLASSES,), minval=-bound, maxval=bound)

    # torch.randn_like(std) equivalent: standard normal noise (deterministic here).
    eps = jax.random.normal(k_eps, (B, NUM_CLASSES), dtype=jnp.float32)

    z = featpro_forward(x, w_mu, b_mu, w_var, b_var, eps)
    z = jax.block_until_ready(z)

    # Pure-JAX reference check.
    pooled_ref = jnp.mean(x.reshape(B, C, H * W), axis=-1)
    mu_ref = pooled_ref @ w_mu.T + b_mu
    logvar_ref = pooled_ref @ w_var.T + b_var
    z_ref = eps * jnp.exp(logvar_ref / 2.0) + mu_ref
    assert jnp.allclose(z, z_ref, atol=1e-5, rtol=1e-5), "mismatch vs reference"

    print("KERNEL_OK")
</pallas_src>

<mosaic_0001>
module attributes {stable_mosaic.version = 11 : i64} {
  func.func @featpro_kernel(%arg0: i32, %arg1: i32, %arg2: memref<2x4x256xf32, #tpu.memory_space<vmem>>, %arg3: memref<4x256xf32, #tpu.memory_space<vmem>>, %arg4: memref<1x256xf32, #tpu.memory_space<vmem>>, %arg5: memref<2x128xf32, #tpu.memory_space<vmem>>, %arg6: memref<2x128xf32, #tpu.memory_space<vmem>>, %arg7: memref<2x4x128xf32, #tpu.memory_space<vmem>>) attributes {dimension_semantics = [#tpu.dimension_semantics<parallel>, #tpu.dimension_semantics<arbitrary>], iteration_bounds = array<i64: 1, 1>, scalar_prefetch = 0 : i64, scratch_operands = 1 : i64, tpu.core_type = #tpu.core_type<tc>, window_params = [{transform_indices = @transform_0, window_bounds = array<i64: 2, 4, 256>}, {pipeline_mode = #tpu.pipeline_mode<synchronous>, transform_indices = @transform_1, window_bounds = array<i64: 4, 256>}, {pipeline_mode = #tpu.pipeline_mode<synchronous>, transform_indices = @transform_2, window_bounds = array<i64: 1, 256>}, {transform_indices = @transform_3, window_bounds = array<i64: 2, 128>}, {transform_indices = @transform_4, window_bounds = array<i64: 2, 128>}]} {
    %c0_i32 = arith.constant 0 : i32
    %0 = arith.cmpi eq, %arg1, %c0_i32 : i32
    %1 = arith.extui %0 : i1 to i32
    %c0_i32_0 = arith.constant 0 : i32
    %2 = arith.cmpi ne, %1, %c0_i32_0 : i32
    scf.if %2 {
      %cst_23 = arith.constant 0.000000e+00 : f32
      %34 = vector.broadcast %cst_23 : f32 to vector<2x4x128xf32>
      %c0_24 = arith.constant 0 : index
      %c0_25 = arith.constant 0 : index
      %c0_26 = arith.constant 0 : index
      %35 = vector.load %arg7[%c0_24, %c0_25, %c0_26] : memref<2x4x128xf32, #tpu.memory_space<vmem>>, vector<2x4x128xf32>
      tpu.vector_store %arg7[%c0_24, %c0_25, %c0_26], %34 {strides = array<i32>} : memref<2x4x128xf32, #tpu.memory_space<vmem>>, vector<2x4x128xf32>,
    } else {
    }
    %c256_i32 = arith.constant 256 : i32
    %3 = arith.muli %arg1, %c256_i32 : i32
    %4 = tpu.iota {dimensions = array<i32: 2>} : vector<1x1x128xi32>
    %c0 = arith.constant 0 : index
    %c0_1 = arith.constant 0 : index
    %c0_2 = arith.constant 0 : index
    %5 = vector.load %arg2[%c0, %c0_1, %c0_2] : memref<2x4x256xf32, #tpu.memory_space<vmem>>, vector<2x4x128xf32>
    %c0_i32_3 = arith.constant 0 : i32
    %6 = arith.addi %3, %c0_i32_3 : i32
    %7 = vector.broadcast %6 : i32 to vector<1x1x128xi32>
    %8 = arith.addi %7, %4 : vector<1x1x128xi32>
    %c256_i32_4 = arith.constant 256 : i32
    %9 = vector.broadcast %c256_i32_4 : i32 to vector<1x1x128xi32>
    %10 = arith.cmpi slt, %8, %9 : vector<1x1x128xi32>
    %c0_5 = arith.constant 0 : index
    %c0_6 = arith.constant 0 : index
    %c0_7 = arith.constant 0 : index
    %11 = vector.load %arg7[%c0_5, %c0_6, %c0_7] : memref<2x4x128xf32, #tpu.memory_space<vmem>>, vector<2x4x128xf32>
    %cst = arith.constant 0.000000e+00 : f32
    %12 = vector.shape_cast %10 : vector<1x1x128xi1> to vector<1x1x128xi1>
    %13 = vector.broadcast %12 : vector<1x1x128xi1> to vector<2x4x128xi1>
    %14 = vector.broadcast %cst : f32 to vector<2x4x128xf32>
    %15 = arith.select %13, %5, %14 : vector<2x4x128xi1>, vector<2x4x128xf32>
    %16 = arith.addf %11, %15 : vector<2x4x128xf32>
    %c0_8 = arith.constant 0 : index
    %c0_9 = arith.constant 0 : index
    %c0_10 = arith.constant 0 : index
    %17 = vector.load %arg7[%c0_8, %c0_9, %c0_10] : memref<2x4x128xf32, #tpu.memory_space<vmem>>, vector<2x4x128xf32>
    tpu.vector_store %arg7[%c0_8, %c0_9, %c0_10], %16 {strides = array<i32>} : memref<2x4x128xf32, #tpu.memory_space<vmem>>, vector<2x4x128xf32>,
    %c0_11 = arith.constant 0 : index
    %c0_12 = arith.constant 0 : index
    %c128 = arith.constant 128 : index
    %18 = vector.load %arg2[%c0_11, %c0_12, %c128] : memref<2x4x256xf32, #tpu.memory_space<vmem>>, vector<2x4x128xf32>
    %c128_i32 = arith.constant 128 : i32
    %19 = arith.addi %3, %c128_i32 : i32
    %20 = vector.broadcast %19 : i32 to vector<1x1x128xi32>
    %21 = arith.addi %20, %4 : vector<1x1x128xi32>
    %c256_i32_13 = arith.constant 256 : i32
    %22 = vector.broadcast %c256_i32_13 : i32 to vector<1x1x128xi32>
    %23 = arith.cmpi slt, %21, %22 : vector<1x1x128xi32>
    %c0_14 = arith.constant 0 : index
    %c0_15 = arith.constant 0 : index
    %c0_16 = arith.constant 0 : index
    %24 = vector.load %arg7[%c0_14, %c0_15, %c0_16] : memref<2x4x128xf32, #tpu.memory_space<vmem>>, vector<2x4x128xf32>
    %cst_17 = arith.constant 0.000000e+00 : f32
    %25 = vector.shape_cast %23 : vector<1x1x128xi1> to vector<1x1x128xi1>
    %26 = vector.broadcast %25 : vector<1x1x128xi1> to vector<2x4x128xi1>
    %27 = vector.broadcast %cst_17 : f32 to vector<2x4x128xf32>
    %28 = arith.select %26, %18, %27 : vector<2x4x128xi1>, vector<2x4x128xf32>
    %29 = arith.addf %24, %28 : vector<2x4x128xf32>
    %c0_18 = arith.constant 0 : index
    %c0_19 = arith.constant 0 : index
    %c0_20 = arith.constant 0 : index
    %30 = vector.load %arg7[%c0_18, %c0_19, %c0_20] : memref<2x4x128xf32, #tpu.memory_space<vmem>>, vector<2x4x128xf32>
    tpu.vector_store %arg7[%c0_18, %c0_19, %c0_20], %29 {strides = array<i32>} : memref<2x4x128xf32, #tpu.memory_space<vmem>>, vector<2x4x128xf32>,
    %c0_i32_21 = arith.constant 0 : i32
    %31 = arith.cmpi eq, %arg1, %c0_i32_21 : i32
    %32 = arith.extui %31 : i1 to i32
    %c0_i32_22 = arith.constant 0 : i32
    %33 = arith.cmpi ne, %32, %c0_i32_22 : i32
    scf.if %33 {
      %c0_23 = arith.constant 0 : index
      %c0_24 = arith.constant 0 : index
      %c0_25 = arith.constant 0 : index
      %34 = vector.load %arg7[%c0_23, %c0_24, %c0_25] : memref<2x4x128xf32, #tpu.memory_space<vmem>>, vector<2x4x128xf32>
      %cst_26 = arith.constant dense<0.000000e+00> : vector<2x4xf32>
      %35 = vector.multi_reduction <add>, %34, %cst_26 [2] : vector<2x4x128xf32> to vector<2x4xf32>
      %cst_27 = arith.constant 3.906250e-03 : f32
      %36 = vector.broadcast %cst_27 : f32 to vector<2x4xf32>
      %37 = arith.mulf %35, %36 : vector<2x4xf32>
      %c0_28 = arith.constant 0 : index
      %c0_29 = arith.constant 0 : index
      %38 = vector.load %arg3[%c0_28, %c0_29] : memref<4x256xf32, #tpu.memory_space<vmem>>, vector<4x256xf32>
      %cst_30 = arith.constant dense<0.000000e+00> : vector<2x256xf32>
      %39 = tpu.matmul %37, %38, %cst_30 {dimension_numbers = #tpu.dot_dimension_numbers<[1], [0], [0], [1], [0, 0, 1, 1], [], []>} : vector<2x4xf32>, vector<4x256xf32>, vector<2x256xf32> -> vector<2x256xf32>
      %c0_31 = arith.constant 0 : index
      %c0_32 = arith.constant 0 : index
      %40 = vector.load %arg4[%c0_31, %c0_32] : memref<1x256xf32, #tpu.memory_space<vmem>>, vector<1x256xf32>
      %41 = vector.broadcast %40 : vector<1x256xf32> to vector<2x256xf32>
      %42 = arith.addf %39, %41 : vector<2x256xf32>
      %43 = vector.extract_strided_slice %42 {offsets = [0, 0], sizes = [2, 128], strides = [1, 1]} : vector<2x256xf32> to vector<2x128xf32>
      %44 = vector.extract_strided_slice %42 {offsets = [0, 128], sizes = [2, 128], strides = [1, 1]} : vector<2x256xf32> to vector<2x128xf32>
      %cst_33 = arith.constant 5.000000e-01 : f32
      %45 = vector.broadcast %cst_33 : f32 to vector<2x128xf32>
      %46 = arith.mulf %44, %45 : vector<2x128xf32>
      %47 = math.exp %46 : vector<2x128xf32>
      %c0_34 = arith.constant 0 : index
      %c0_35 = arith.constant 0 : index
      %48 = vector.load %arg5[%c0_34, %c0_35] : memref<2x128xf32, #tpu.memory_space<vmem>>, vector<2x128xf32>
      %49 = arith.mulf %48, %47 : vector<2x128xf32>
      %50 = arith.addf %49, %43 : vector<2x128xf32>
      %c0_36 = arith.constant 0 : index
      %c0_37 = arith.constant 0 : index
      %51 = vector.load %arg6[%c0_36, %c0_37] : memref<2x128xf32, #tpu.memory_space<vmem>>, vector<2x128xf32>
      tpu.vector_store %arg6[%c0_36, %c0_37], %50 {strides = array<i32>} : memref<2x128xf32, #tpu.memory_space<vmem>>, vector<2x128xf32>,
    } else {
    }
    return
  }
  func.func @transform_0(%arg0: i32, %arg1: i32) -> (i32, i32, i32) {
    %c0_i32 = arith.constant 0 : i32
    %c0_i32_0 = arith.constant 0 : i32
    return %arg0, %c0_i32, %arg1 : i32, i32, i32
  }
  func.func @transform_1(%arg0: i32, %arg1: i32) -> (i32, i32) {
    %c0_i32 = arith.constant 0 : i32
    %c0_i32_0 = arith.constant 0 : i32
    %c0_i32_1 = arith.constant 0 : i32
    return %c0_i32, %c0_i32_0 : i32, i32
  }
  func.func @transform_2(%arg0: i32, %arg1: i32) -> (i32, i32) {
    %c0_i32 = arith.constant 0 : i32
    %c0_i32_0 = arith.constant 0 : i32
    %c0_i32_1 = arith.constant 0 : i32
    return %c0_i32, %c0_i32_0 : i32, i32
  }
  func.func @transform_3(%arg0: i32, %arg1: i32) -> (i32, i32) {
    %c0_i32 = arith.constant 0 : i32
    %c0_i32_0 = arith.constant 0 : i32
    return %arg0, %c0_i32 : i32, i32
  }
  func.func @transform_4(%arg0: i32, %arg1: i32) -> (i32, i32) {
    %c0_i32 = arith.constant 0 : i32
    %c0_i32_0 = arith.constant 0 : i32
    return %arg0, %c0_i32 : i32, i32
  }
}

</mosaic_0001>

<bundles_post_ra>
// kernel: tpu_custom_call.1
= control target key start
LH: loop header
LB: loop body
LE: loop exit
PB: predicated region body
PF: predicated region fallthrough
CT: control target
= control target key end

     0   :  { %9 = vsyncpa [#allocation4], 0  ;;  %s350_s0 = inlined_call_operand.hbm [shape: f32[2,4,256], index: 0, kind: input, shape index: {}]   ;;  %s351_s1 = inlined_call_operand.hbm [shape: f32[4,256], index: 1, kind: input, shape index: {}]   ;;  %s352_s2 = inlined_call_operand.vmem [shape: f32[1,256], index: 2, kind: input, shape index: {}]   ;;  %s353_s3 = inlined_call_operand.vmem [shape: f32[2,128], index: 3, kind: input, shape index: {}]   ;;  %s354_s4 = inlined_call_operand.hbm [shape: f32[2,128], index: 4, kind: output, shape index: {}]  }
   0x1   :  { %10 = vsyncpa [#allocation7], 0 }
   0x2   :  { %11 = vsyncpa [#allocation5], 0  ;;  %s304_s15 = smov [#allocation3]  }
   0x3   :  { %s17_s16 = sshll.u32 %s304_s15, 4  ;;  %s18_s16 = int_to_ptr.vmem [resolvable:$true] %s17_s16 }
   0x4   :  { %s246_s17 = scalar_lea.vmem %s18_s16, 256  ;;  %p251_p1 = scmp.lt.s32.totalorder %s18_s16, %s18_s16 }
   0x5   :  { %p247_p0 = scmp.ne.s32.totalorder %s18_s16, %s246_s17  ;;  %p252_p2 = scmp.lt.s32.totalorder %s246_s17, %s246_s17 }
   0x7   :  { %p253_p3 = por %p252_p2, %p251_p1 }
   0x9   :  { %p254_p4 = pnand %p253_p3, %p247_p0 }
   0xb   :  { %257 = shalt.err (!%p254_p4)
}
   0xc   :  { %s305_s18 = smov 128   ;;  %s306_s19 = smov 8  }
   0xd   :  { %23 = dma.hbm_to_vmem [thread:$0]  %s350_s0, 256, %s18_s16, [#allocation4], %s305_s18, %s305_s18, %s306_s19  }
   0xe   :  { %s307_s22 = smov [#allocation6]  }
   0xf   :  { %s30_s23 = sshll.u32 %s307_s22, 4  ;;  %s31_s23 = int_to_ptr.vmem [resolvable:$true] %s30_s23 }
  0x10   :  { %s266_s24 = scalar_lea.vmem %s31_s23, 128  ;;  %p271_p6 = scmp.lt.s32.totalorder %s31_s23, %s31_s23 }
  0x11   :  { %p267_p5 = scmp.ne.s32.totalorder %s31_s23, %s266_s24  ;;  %p272_p7 = scmp.lt.s32.totalorder %s266_s24, %s266_s24 }
  0x13   :  { %p273_p8 = por %p272_p7, %p271_p6 }
  0x15   :  { %p274_p9 = pnand %p273_p8, %p267_p5 }
  0x17   :  { %277 = shalt.err (!%p274_p9)
}
  0x18   :  { %33 = dma.hbm_to_vmem [thread:$0]  %s351_s1, 128, %s31_s23, [#allocation7]  }
  0x19   :  { %298 = dma.done.wait [#allocation4], 256  }
  0x1a   :  { %299 = vsyncadd [#allocation4], 4294967040 }
  0x1b   :  { %300 = dma.done.wait [#allocation7], 128  }
  0x1c   :  { %301 = vsyncadd [#allocation7], 4294967168  ;;  %v308_v0 = vmov 0.0   ;;  %v53_v1 = vld [vmem:[#allocation3] sm:$0xf]  ;;  %vm89_vm0 = vcmask 1043456   ;;  %v51_v19 = vlaneseq }
  0x1d   :  { %48 = vst [vmem:[#allocation2] sm:$0xf] %v308_v0  ;;  %49 = vst [vmem:[#allocation2 + $0x4] sm:$0xf] %v308_v0  ;;  %196 = vmatprep.mubr.f32.mxu0 %v308_v0  ;;  %v54_v2 = vld [vmem:[#allocation3 + $0x8] sm:$0xf] }
  0x1e   :  { %v68_v7 = vld [vmem:[#allocation3 + $0x4] sm:$0xf]  ;;  %v69_v8 = vld [vmem:[#allocation3 + $0xc] sm:$0xf]  ;;  %v98_v17 = vld [vmem:[#allocation6] sm:$0xff]  ;;  %v52_v20 = vand.u32 127, %v51_v19 }
  0x1f   :  { %v124_v18 = vcombine.high %v98_v17, %v98_v17  ;;  %v102_v21 = vshrl.u32 %v51_v19, 7  ;;  %vm121_vm1 = vcmask 1041409   ;;  %vm125_vm2 = vcmask 31744   ;;  %v99_v31 = vld [vmem:[%s352_s2] sm:$0x3]  ;;  %s309_s29 = smov [#allocation8]  }
  0x20   :  { %v206_v40 = vld [vmem:[%s353_s3] sm:$0x3]  ;;  %s216_s30 = sshll.u32 %s309_s29, 4  ;;  %s217_s30 = int_to_ptr.vmem [resolvable:$true] %s216_s30 }
  0x21   :  { %226 = vmatprep.subr.msk.mxu0 %vm89_vm0, %v124_v18  ;;  %v115_v23 = vsub.s32 %v52_v20, %v102_v21  ;;  %v107_v30 = vsub.s32 1, %v102_v21  ;;  %v103_v38 = vsub.s32 0, %v102_v21  ;;  %s278_s2 = scalar_lea.vmem %s217_s30, 32  ;;  %p283_p11 = scmp.lt.s32.totalorder %s217_s30, %s217_s30 }
  0x22   :  { %227 = vmatpush1.msk.msra.mxu0 %vm89_vm0, %v98_v17  ;;  %p279_p10 = scmp.ne.s32.totalorder %s217_s30, %s278_s2  ;;  %p284_p12 = scmp.lt.s32.totalorder %s278_s2, %s278_s2 }
  0x23   :  { %v108_v32 = vrot.slane %v99_v31, %v107_v30  ;;  %v104_v39 = vrot.slane %v99_v31, %v103_v38 }
  0x24   :  { %v58_v3 = vld [vmem:[#allocation2] sm:$0xf]  ;;  %v59_v4 = vld [vmem:[#allocation2 + $0x4] sm:$0xf]  ;;  %p285_p13 = por %p284_p12, %p283_p11 }
  0x25   :  { %v64_v5 = vadd.f32 %v58_v3, %v53_v1  ;;  %v65_v6 = vadd.f32 %v59_v4, %v54_v2 }
  0x26   :  { %p286_p0 = pnand %p285_p13, %p279_p10 }
  0x27   :  { %66 = vst [vmem:[#allocation2] sm:$0xf] %v64_v5  ;;  %67 = vst [vmem:[#allocation2 + $0x4] sm:$0xf] %v65_v6 }
  0x2e   :  { %v74_v9 = vld [vmem:[#allocation2] sm:$0xf]  ;;  %v75_v10 = vld [vmem:[#allocation2 + $0x4] sm:$0xf] }
  0x2f   :  { %v80_v11 = vadd.f32 %v74_v9, %v68_v7  ;;  %v81_v12 = vadd.f32 %v75_v10, %v69_v8 }
  0x31   :  { %82 = vst [vmem:[#allocation2] sm:$0xf] %v80_v11  ;;  %83 = vst [vmem:[#allocation2 + $0x4] sm:$0xf] %v81_v12 }
  0x38   :  { %v87_v13 = vld [vmem:[#allocation2] sm:$0xf]  ;;  %v88_v14 = vld [vmem:[#allocation2 + $0x4] sm:$0xf] }
  0x39   :  { %v90_v15 = vsel %vm89_vm0, %v87_v13, 0.0  ;;  %v93_v16 = vsel %vm89_vm0, %v88_v14, 0.0 }
  0x3a   :  { %91 = vadd.xlane.f32.xlu0 %v90_v15 }
  0x3e   :  { %94 = vadd.xlane.f32.xlu0 %v93_v16 }
  0xc3   :  { %v92_v22 = vpop.xlane.xlu0 %91 }
  0xc4   :  { %v96_v24 = vmul.f32 0.00390625, %v92_v22 }
  0xc6   :  { %v116_v27 = vrot.slane %v96_v24, %v115_v23 }
  0xc7   :  { %v95_v25 = vpop.xlane.xlu0 %94 }
  0xc8   :  { %v97_v26 = vmul.f32 0.00390625, %v95_v25 }
  0xca   :  { %v120_v28 = vrot.slane %v97_v26, %v115_v23 }
  0xcc   :  { %v122_v29 = vsel %vm121_vm1, %v120_v28, %v116_v27 }
  0xcd   :  { %228 = vmatmul.mubr.msk.f32.vlgmr.msra.gmra.mxu0 %vm125_vm2, %v122_v29 }
 0x18d   :  { %v198_v33 = vpop.f32.mrf.mxu0 }
 0x18e   :  { %v199_v42 = vadd.f32 %v198_v33, %v104_v39 }
 0x18f   :  { %v200_v34 = vpop.f32.mrf.mxu0 }
 0x190   :  { %v201_v35 = vadd.f32 %v200_v34, %v108_v32 }
 0x192   :  { %v203_v36 = vmul.f32 0.5, %v201_v35 }
 0x194   :  { %v204_v37 = vmul.f32 1.442695, %v203_v36 }
 0x196   :  { %236 = vpow2.f32 %v204_v37 }
 0x1a3   :  { %v237_v41 = vpop.eup %236 }
 0x1a4   :  { %v207_v43 = vmul.f32 %v237_v41, %v206_v40 }
 0x1a6   :  { %v208_v44 = vadd.f32 %v207_v43, %v199_v42 }
 0x1a8   :  { %209 = vst [vmem:[#allocation8] sm:$0x3] %v208_v44 }
 0x1a9   :  { %289 = shalt.err (!%p286_p0)
}
 0x1aa   :  { %219 = dma.vmem_to_hbm [thread:$0]  %s217_s30, 32, %s354_s4, [#allocation5]  }
 0x1ab   :  { %302 = dma.done.wait [#allocation5], 32  }
 0x1ac   :  { %303 = vsyncadd [#allocation5], 4294967264 }
 0x1ad   :  { %223 = vsyncpa [#allocation4], 1 }
 0x1ae   :  { %224 = vsyncpa [#allocation7], 1 }
 0x1af   :  { %225 = vsyncpa [#allocation5], 1 }

</bundles_post_ra>
